<compile_context>
chip_gen: v6e
topology: v6e:2x2x1
jax: 0.10.0
libtpu: 0.0.40
codegen_flags: <defaults>
</compile_context>

<pallas_src>
import functools

import jax
import jax.numpy as jnp
from jax.experimental import pallas as pl
from jax.experimental.pallas import tpu as pltpu

INPUT_SIZE = 34
NUM_CLASSES = 5
NUM_HIDDEN_LAYERS = 8
HIDDEN_SIZE = 16

LANE = 128
SUB = 8
MAX_TILE_B = 1024  # 512-2048 is safe on all of v5e/v6e/v7x at these weight sizes


def _round_up(x, m):
    return ((x + m - 1) // m) * m


DIN_P = _round_up(INPUT_SIZE, SUB)      # 40  : first-layer K (sublane aligned only)
HID_P = _round_up(HIDDEN_SIZE, LANE)    # 128 : lane-padded hidden width
CLS_P = _round_up(NUM_CLASSES, LANE)    # 128 : lane-padded output width
N_MID = NUM_HIDDEN_LAYERS - 1           # 7 hidden 16->16 layers
N_LAYERS = NUM_HIDDEN_LAYERS + 1        # 9 linear layers total (stacked biases)


def mlp_kernel(x_ref, w1_ref, wh_ref, wo_ref, b_ref, out_ref, *, n_mid):
    # First layer: (TILE_B, 40) @ (40, 128) -> (TILE_B, 128), then bias + ReLU.
    h = jnp.dot(x_ref[...], w1_ref[...], preferred_element_type=jnp.float32)
    h = jnp.maximum(h + b_ref[0], 0.0)

    # Hidden layers: contract only the 16 real lanes against (16, 128) weights.
    for i in range(n_mid):
        h = jnp.dot(h[:, :HIDDEN_SIZE], wh_ref[i],
                    preferred_element_type=jnp.float32)
        h = jnp.maximum(h + b_ref[1 + i], 0.0)

    # Output layer (no activation); output block is lane-dense (128 lanes).
    o = jnp.dot(h[:, :HIDDEN_SIZE], wo_ref[...],
                preferred_element_type=jnp.float32)
    out_ref[...] = o + b_ref[n_mid + 1]


def prepare_params(params):
    """Pad / stack parameters ONCE (hoisted out of the per-call forward path)."""
    (w1, b1), mids, (wo, bo) = params

    w1p = jnp.pad(w1.astype(jnp.float32),
                  ((0, DIN_P - INPUT_SIZE), (0, HID_P - HIDDEN_SIZE)))
    whp = jnp.pad(jnp.stack([w for w, _ in mids]).astype(jnp.float32),
                  ((0, 0), (0, 0), (0, HID_P - HIDDEN_SIZE)))
    wop = jnp.pad(wo.astype(jnp.float32),
                  ((0, 0), (0, CLS_P - NUM_CLASSES)))

    b_all = jnp.stack(
        [jnp.pad(b1.astype(jnp.float32), (0, HID_P - HIDDEN_SIZE))]
        + [jnp.pad(b.astype(jnp.float32), (0, HID_P - HIDDEN_SIZE)) for _, b in mids]
        + [jnp.pad(bo.astype(jnp.float32), (0, CLS_P - NUM_CLASSES))]
    )[:, None, :]  # (n_layers, 1, 128)

    return w1p, whp, wop, b_all


def simple_classifier_forward(x, padded_params):
    """x: (B, INPUT_SIZE) float32. padded_params: output of prepare_params()."""
    w1p, whp, wop, b_all = padded_params
    n_mid = whp.shape[0]
    n_layers = b_all.shape[0]

    B = x.shape[0]
    tile_b = min(MAX_TILE_B, _round_up(B, SUB))
    Bp = _round_up(B, tile_b)
    grid = (Bp // tile_b,)

    # Zero-pad input rows / lanes (padded lanes must be zero for correctness).
    xp = jnp.zeros((Bp, DIN_P), jnp.float32).at[:B, :INPUT_SIZE].set(x)

    kernel = functools.partial(mlp_kernel, n_mid=n_mid)

    out_padded = pl.pallas_call(
        kernel,
        out_shape=jax.ShapeDtypeStruct((Bp, CLS_P), jnp.float32),
        grid=grid,
        in_specs=[
            # x: tiled over the batch grid axis (pipelined load).
            pl.BlockSpec((tile_b, DIN_P), lambda i: (i, 0)),
            # Weights / biases: constant block index -> fetched once, VMEM-resident.
            pl.BlockSpec((DIN_P, HID_P), lambda i: (0, 0)),
            pl.BlockSpec((n_mid, HIDDEN_SIZE, HID_P), lambda i: (0, 0, 0)),
            pl.BlockSpec((HIDDEN_SIZE, CLS_P), lambda i: (0, 0)),
            pl.BlockSpec((n_layers, 1, HID_P), lambda i: (0, 0, 0)),
        ],
        out_specs=pl.BlockSpec((tile_b, CLS_P), lambda i: (i, 0)),
        compiler_params=pltpu.CompilerParams(
            dimension_semantics=("parallel",),        # megacore-shard batch on v7x
            vmem_limit_bytes=32 * 1024 * 1024,        # safe on v5e/v6e/v7x
        ),
    )(xp, w1p, whp, wop, b_all)

    return out_padded[:B, :NUM_CLASSES]


def init_params(key):
    """Deterministic init mirroring nn.Linear shapes (weights stored as (in, out))."""
    keys = jax.random.split(key, 2 * NUM_HIDDEN_LAYERS + 2)
    kidx = 0

    def linear(kw, kb, fan_in, fan_out):
        bound = 1.0 / jnp.sqrt(fan_in)
        w = jax.random.uniform(kw, (fan_in, fan_out), jnp.float32, -bound, bound)
        b = jax.random.uniform(kb, (fan_out,), jnp.float32, -bound, bound)
        return w, b

    first = linear(keys[kidx], keys[kidx + 1], INPUT_SIZE, HIDDEN_SIZE); kidx += 2
    mids = []
    for _ in range(NUM_HIDDEN_LAYERS - 1):
        mids.append(linear(keys[kidx], keys[kidx + 1], HIDDEN_SIZE, HIDDEN_SIZE))
        kidx += 2
    out = linear(keys[kidx], keys[kidx + 1], HIDDEN_SIZE, NUM_CLASSES)
    return first, mids, out


def reference_forward(x, params):
    (w1, b1), mids, (wo, bo) = params
    h = jnp.maximum(x @ w1 + b1, 0.0)
    for w, b in mids:
        h = jnp.maximum(h @ w + b, 0.0)
    return h @ wo + bo


if __name__ == "__main__":
    key = jax.random.PRNGKey(0)
    kx, kp = jax.random.split(key)
    params = init_params(kp)
    padded_params = prepare_params(params)  # padding done once, outside forward

    # Small canonical check (batch=2).
    batch = 2
    x = jax.random.normal(kx, (batch, INPUT_SIZE), jnp.float32)
    out = simple_classifier_forward(x, padded_params)
    out = jax.block_until_ready(out)
    ref = reference_forward(x, params)
    assert out.shape == (batch, NUM_CLASSES)
    assert jnp.allclose(out, ref, atol=1e-4, rtol=1e-4), "mismatch vs reference (batch=2)"

    # Exercise the multi-tile grid path (2 batch tiles + padded tail rows).
    x2 = jax.random.normal(jax.random.PRNGKey(1), (1040, INPUT_SIZE), jnp.float32)
    out2 = jax.block_until_ready(simple_classifier_forward(x2, padded_params))
    ref2 = reference_forward(x2, params)
    assert jnp.allclose(out2, ref2, atol=1e-4, rtol=1e-4), "mismatch vs reference (tiled)"

    print("KERNEL_OK")
</pallas_src>

<mosaic_0001>
module attributes {stable_mosaic.version = 11 : i64} {
  func.func @mlp_kernel(%arg0: i32, %arg1: memref<8x40xf32, #tpu.memory_space<vmem>>, %arg2: memref<40x128xf32, #tpu.memory_space<vmem>>, %arg3: memref<7x16x128xf32, #tpu.memory_space<vmem>>, %arg4: memref<16x128xf32, #tpu.memory_space<vmem>>, %arg5: memref<9x1x128xf32, #tpu.memory_space<vmem>>, %arg6: memref<8x128xf32, #tpu.memory_space<vmem>>) attributes {dimension_semantics = [#tpu.dimension_semantics<parallel>], iteration_bounds = array<i64: 1>, scalar_prefetch = 0 : i64, scratch_operands = 0 : i64, tpu.core_type = #tpu.core_type<tc>, window_params = [{transform_indices = @transform_0, window_bounds = array<i64: 8, 40>}, {pipeline_mode = #tpu.pipeline_mode<synchronous>, transform_indices = @transform_1, window_bounds = array<i64: 40, 128>}, {pipeline_mode = #tpu.pipeline_mode<synchronous>, transform_indices = @transform_2, window_bounds = array<i64: 7, 16, 128>}, {pipeline_mode = #tpu.pipeline_mode<synchronous>, transform_indices = @transform_3, window_bounds = array<i64: 16, 128>}, {pipeline_mode = #tpu.pipeline_mode<synchronous>, transform_indices = @transform_4, window_bounds = array<i64: 9, 1, 128>}, {transform_indices = @transform_5, window_bounds = array<i64: 8, 128>}]} {
    %c0 = arith.constant 0 : index
    %c0_0 = arith.constant 0 : index
    %0 = vector.load %arg1[%c0, %c0_0] : memref<8x40xf32, #tpu.memory_space<vmem>>, vector<8x40xf32>
    %c0_1 = arith.constant 0 : index
    %c0_2 = arith.constant 0 : index
    %1 = vector.load %arg2[%c0_1, %c0_2] : memref<40x128xf32, #tpu.memory_space<vmem>>, vector<40x128xf32>
    %cst = arith.constant dense<0.000000e+00> : vector<8x128xf32>
    %2 = tpu.matmul %0, %1, %cst {dimension_numbers = #tpu.dot_dimension_numbers<[1], [0], [0], [1], [0, 0, 1, 1], [], []>} : vector<8x40xf32>, vector<40x128xf32>, vector<8x128xf32> -> vector<8x128xf32>
    %c0_3 = arith.constant 0 : index
    %c0_4 = arith.constant 0 : index
    %c0_5 = arith.constant 0 : index
    %3 = vector.load %arg5[%c0_3, %c0_4, %c0_5] : memref<9x1x128xf32, #tpu.memory_space<vmem>>, vector<1x1x128xf32>
    %4 = vector.shape_cast %3 : vector<1x1x128xf32> to vector<1x128xf32>
    %5 = vector.broadcast %4 : vector<1x128xf32> to vector<8x128xf32>
    %6 = arith.addf %2, %5 : vector<8x128xf32>
    %cst_6 = arith.constant 0.000000e+00 : f32
    %7 = vector.broadcast %cst_6 : f32 to vector<8x128xf32>
    %8 = arith.maximumf %6, %7 : vector<8x128xf32>
    %9 = vector.extract_strided_slice %8 {offsets = [0, 0], sizes = [8, 16], strides = [1, 1]} : vector<8x128xf32> to vector<8x16xf32>
    %c0_7 = arith.constant 0 : index
    %c0_8 = arith.constant 0 : index
    %c0_9 = arith.constant 0 : index
    %10 = vector.load %arg3[%c0_7, %c0_8, %c0_9] : memref<7x16x128xf32, #tpu.memory_space<vmem>>, vector<1x16x128xf32>
    %11 = vector.shape_cast %10 : vector<1x16x128xf32> to vector<16x128xf32>
    %cst_10 = arith.constant dense<0.000000e+00> : vector<8x128xf32>
    %12 = tpu.matmul %9, %11, %cst_10 {dimension_numbers = #tpu.dot_dimension_numbers<[1], [0], [0], [1], [0, 0, 1, 1], [], []>} : vector<8x16xf32>, vector<16x128xf32>, vector<8x128xf32> -> vector<8x128xf32>
    %c1 = arith.constant 1 : index
    %c0_11 = arith.constant 0 : index
    %c0_12 = arith.constant 0 : index
    %13 = vector.load %arg5[%c1, %c0_11, %c0_12] : memref<9x1x128xf32, #tpu.memory_space<vmem>>, vector<1x1x128xf32>
    %14 = vector.shape_cast %13 : vector<1x1x128xf32> to vector<1x128xf32>
    %15 = vector.broadcast %14 : vector<1x128xf32> to vector<8x128xf32>
    %16 = arith.addf %12, %15 : vector<8x128xf32>
    %cst_13 = arith.constant 0.000000e+00 : f32
    %17 = vector.broadcast %cst_13 : f32 to vector<8x128xf32>
    %18 = arith.maximumf %16, %17 : vector<8x128xf32>
    %19 = vector.extract_strided_slice %18 {offsets = [0, 0], sizes = [8, 16], strides = [1, 1]} : vector<8x128xf32> to vector<8x16xf32>
    %c1_14 = arith.constant 1 : index
    %c0_15 = arith.constant 0 : index
    %c0_16 = arith.constant 0 : index
    %20 = vector.load %arg3[%c1_14, %c0_15, %c0_16] : memref<7x16x128xf32, #tpu.memory_space<vmem>>, vector<1x16x128xf32>
    %21 = vector.shape_cast %20 : vector<1x16x128xf32> to vector<16x128xf32>
    %cst_17 = arith.constant dense<0.000000e+00> : vector<8x128xf32>
    %22 = tpu.matmul %19, %21, %cst_17 {dimension_numbers = #tpu.dot_dimension_numbers<[1], [0], [0], [1], [0, 0, 1, 1], [], []>} : vector<8x16xf32>, vector<16x128xf32>, vector<8x128xf32> -> vector<8x128xf32>
    %c2 = arith.constant 2 : index
    %c0_18 = arith.constant 0 : index
    %c0_19 = arith.constant 0 : index
    %23 = vector.load %arg5[%c2, %c0_18, %c0_19] : memref<9x1x128xf32, #tpu.memory_space<vmem>>, vector<1x1x128xf32>
    %24 = vector.shape_cast %23 : vector<1x1x128xf32> to vector<1x128xf32>
    %25 = vector.broadcast %24 : vector<1x128xf32> to vector<8x128xf32>
    %26 = arith.addf %22, %25 : vector<8x128xf32>
    %cst_20 = arith.constant 0.000000e+00 : f32
    %27 = vector.broadcast %cst_20 : f32 to vector<8x128xf32>
    %28 = arith.maximumf %26, %27 : vector<8x128xf32>
    %29 = vector.extract_strided_slice %28 {offsets = [0, 0], sizes = [8, 16], strides = [1, 1]} : vector<8x128xf32> to vector<8x16xf32>
    %c2_21 = arith.constant 2 : index
    %c0_22 = arith.constant 0 : index
    %c0_23 = arith.constant 0 : index
    %30 = vector.load %arg3[%c2_21, %c0_22, %c0_23] : memref<7x16x128xf32, #tpu.memory_space<vmem>>, vector<1x16x128xf32>
    %31 = vector.shape_cast %30 : vector<1x16x128xf32> to vector<16x128xf32>
    %cst_24 = arith.constant dense<0.000000e+00> : vector<8x128xf32>
    %32 = tpu.matmul %29, %31, %cst_24 {dimension_numbers = #tpu.dot_dimension_numbers<[1], [0], [0], [1], [0, 0, 1, 1], [], []>} : vector<8x16xf32>, vector<16x128xf32>, vector<8x128xf32> -> vector<8x128xf32>
    %c3 = arith.constant 3 : index
    %c0_25 = arith.constant 0 : index
    %c0_26 = arith.constant 0 : index
    %33 = vector.load %arg5[%c3, %c0_25, %c0_26] : memref<9x1x128xf32, #tpu.memory_space<vmem>>, vector<1x1x128xf32>
    %34 = vector.shape_cast %33 : vector<1x1x128xf32> to vector<1x128xf32>
    %35 = vector.broadcast %34 : vector<1x128xf32> to vector<8x128xf32>
    %36 = arith.addf %32, %35 : vector<8x128xf32>
    %cst_27 = arith.constant 0.000000e+00 : f32
    %37 = vector.broadcast %cst_27 : f32 to vector<8x128xf32>
    %38 = arith.maximumf %36, %37 : vector<8x128xf32>
    %39 = vector.extract_strided_slice %38 {offsets = [0, 0], sizes = [8, 16], strides = [1, 1]} : vector<8x128xf32> to vector<8x16xf32>
    %c3_28 = arith.constant 3 : index
    %c0_29 = arith.constant 0 : index
    %c0_30 = arith.constant 0 : index
    %40 = vector.load %arg3[%c3_28, %c0_29, %c0_30] : memref<7x16x128xf32, #tpu.memory_space<vmem>>, vector<1x16x128xf32>
    %41 = vector.shape_cast %40 : vector<1x16x128xf32> to vector<16x128xf32>
    %cst_31 = arith.constant dense<0.000000e+00> : vector<8x128xf32>
    %42 = tpu.matmul %39, %41, %cst_31 {dimension_numbers = #tpu.dot_dimension_numbers<[1], [0], [0], [1], [0, 0, 1, 1], [], []>} : vector<8x16xf32>, vector<16x128xf32>, vector<8x128xf32> -> vector<8x128xf32>
    %c4 = arith.constant 4 : index
    %c0_32 = arith.constant 0 : index
    %c0_33 = arith.constant 0 : index
    %43 = vector.load %arg5[%c4, %c0_32, %c0_33] : memref<9x1x128xf32, #tpu.memory_space<vmem>>, vector<1x1x128xf32>
    %44 = vector.shape_cast %43 : vector<1x1x128xf32> to vector<1x128xf32>
    %45 = vector.broadcast %44 : vector<1x128xf32> to vector<8x128xf32>
    %46 = arith.addf %42, %45 : vector<8x128xf32>
    %cst_34 = arith.constant 0.000000e+00 : f32
    %47 = vector.broadcast %cst_34 : f32 to vector<8x128xf32>
    %48 = arith.maximumf %46, %47 : vector<8x128xf32>
    %49 = vector.extract_strided_slice %48 {offsets = [0, 0], sizes = [8, 16], strides = [1, 1]} : vector<8x128xf32> to vector<8x16xf32>
    %c4_35 = arith.constant 4 : index
    %c0_36 = arith.constant 0 : index
    %c0_37 = arith.constant 0 : index
    %50 = vector.load %arg3[%c4_35, %c0_36, %c0_37] : memref<7x16x128xf32, #tpu.memory_space<vmem>>, vector<1x16x128xf32>
    %51 = vector.shape_cast %50 : vector<1x16x128xf32> to vector<16x128xf32>
    %cst_38 = arith.constant dense<0.000000e+00> : vector<8x128xf32>
    %52 = tpu.matmul %49, %51, %cst_38 {dimension_numbers = #tpu.dot_dimension_numbers<[1], [0], [0], [1], [0, 0, 1, 1], [], []>} : vector<8x16xf32>, vector<16x128xf32>, vector<8x128xf32> -> vector<8x128xf32>
    %c5 = arith.constant 5 : index
    %c0_39 = arith.constant 0 : index
    %c0_40 = arith.constant 0 : index
    %53 = vector.load %arg5[%c5, %c0_39, %c0_40] : memref<9x1x128xf32, #tpu.memory_space<vmem>>, vector<1x1x128xf32>
    %54 = vector.shape_cast %53 : vector<1x1x128xf32> to vector<1x128xf32>
    %55 = vector.broadcast %54 : vector<1x128xf32> to vector<8x128xf32>
    %56 = arith.addf %52, %55 : vector<8x128xf32>
    %cst_41 = arith.constant 0.000000e+00 : f32
    %57 = vector.broadcast %cst_41 : f32 to vector<8x128xf32>
    %58 = arith.maximumf %56, %57 : vector<8x128xf32>
    %59 = vector.extract_strided_slice %58 {offsets = [0, 0], sizes = [8, 16], strides = [1, 1]} : vector<8x128xf32> to vector<8x16xf32>
    %c5_42 = arith.constant 5 : index
    %c0_43 = arith.constant 0 : index
    %c0_44 = arith.constant 0 : index
    %60 = vector.load %arg3[%c5_42, %c0_43, %c0_44] : memref<7x16x128xf32, #tpu.memory_space<vmem>>, vector<1x16x128xf32>
    %61 = vector.shape_cast %60 : vector<1x16x128xf32> to vector<16x128xf32>
    %cst_45 = arith.constant dense<0.000000e+00> : vector<8x128xf32>
    %62 = tpu.matmul %59, %61, %cst_45 {dimension_numbers = #tpu.dot_dimension_numbers<[1], [0], [0], [1], [0, 0, 1, 1], [], []>} : vector<8x16xf32>, vector<16x128xf32>, vector<8x128xf32> -> vector<8x128xf32>
    %c6 = arith.constant 6 : index
    %c0_46 = arith.constant 0 : index
    %c0_47 = arith.constant 0 : index
    %63 = vector.load %arg5[%c6, %c0_46, %c0_47] : memref<9x1x128xf32, #tpu.memory_space<vmem>>, vector<1x1x128xf32>
    %64 = vector.shape_cast %63 : vector<1x1x128xf32> to vector<1x128xf32>
    %65 = vector.broadcast %64 : vector<1x128xf32> to vector<8x128xf32>
    %66 = arith.addf %62, %65 : vector<8x128xf32>
    %cst_48 = arith.constant 0.000000e+00 : f32
    %67 = vector.broadcast %cst_48 : f32 to vector<8x128xf32>
    %68 = arith.maximumf %66, %67 : vector<8x128xf32>
    %69 = vector.extract_strided_slice %68 {offsets = [0, 0], sizes = [8, 16], strides = [1, 1]} : vector<8x128xf32> to vector<8x16xf32>
    %c6_49 = arith.constant 6 : index
    %c0_50 = arith.constant 0 : index
    %c0_51 = arith.constant 0 : index
    %70 = vector.load %arg3[%c6_49, %c0_50, %c0_51] : memref<7x16x128xf32, #tpu.memory_space<vmem>>, vector<1x16x128xf32>
    %71 = vector.shape_cast %70 : vector<1x16x128xf32> to vector<16x128xf32>
    %cst_52 = arith.constant dense<0.000000e+00> : vector<8x128xf32>
    %72 = tpu.matmul %69, %71, %cst_52 {dimension_numbers = #tpu.dot_dimension_numbers<[1], [0], [0], [1], [0, 0, 1, 1], [], []>} : vector<8x16xf32>, vector<16x128xf32>, vector<8x128xf32> -> vector<8x128xf32>
    %c7 = arith.constant 7 : index
    %c0_53 = arith.constant 0 : index
    %c0_54 = arith.constant 0 : index
    %73 = vector.load %arg5[%c7, %c0_53, %c0_54] : memref<9x1x128xf32, #tpu.memory_space<vmem>>, vector<1x1x128xf32>
    %74 = vector.shape_cast %73 : vector<1x1x128xf32> to vector<1x128xf32>
    %75 = vector.broadcast %74 : vector<1x128xf32> to vector<8x128xf32>
    %76 = arith.addf %72, %75 : vector<8x128xf32>
    %cst_55 = arith.constant 0.000000e+00 : f32
    %77 = vector.broadcast %cst_55 : f32 to vector<8x128xf32>
    %78 = arith.maximumf %76, %77 : vector<8x128xf32>
    %79 = vector.extract_strided_slice %78 {offsets = [0, 0], sizes = [8, 16], strides = [1, 1]} : vector<8x128xf32> to vector<8x16xf32>
    %c0_56 = arith.constant 0 : index
    %c0_57 = arith.constant 0 : index
    %80 = vector.load %arg4[%c0_56, %c0_57] : memref<16x128xf32, #tpu.memory_space<vmem>>, vector<16x128xf32>
    %cst_58 = arith.constant dense<0.000000e+00> : vector<8x128xf32>
    %81 = tpu.matmul %79, %80, %cst_58 {dimension_numbers = #tpu.dot_dimension_numbers<[1], [0], [0], [1], [0, 0, 1, 1], [], []>} : vector<8x16xf32>, vector<16x128xf32>, vector<8x128xf32> -> vector<8x128xf32>
    %c8 = arith.constant 8 : index
    %c0_59 = arith.constant 0 : index
    %c0_60 = arith.constant 0 : index
    %82 = vector.load %arg5[%c8, %c0_59, %c0_60] : memref<9x1x128xf32, #tpu.memory_space<vmem>>, vector<1x1x128xf32>
    %83 = vector.shape_cast %82 : vector<1x1x128xf32> to vector<1x128xf32>
    %84 = vector.broadcast %83 : vector<1x128xf32> to vector<8x128xf32>
    %85 = arith.addf %81, %84 : vector<8x128xf32>
    %c0_61 = arith.constant 0 : index
    %c0_62 = arith.constant 0 : index
    %86 = vector.load %arg6[%c0_61, %c0_62] : memref<8x128xf32, #tpu.memory_space<vmem>>, vector<8x128xf32>
    tpu.vector_store %arg6[%c0_61, %c0_62], %85 {strides = array<i32>} : memref<8x128xf32, #tpu.memory_space<vmem>>, vector<8x128xf32>,
    return
  }
  func.func @transform_0(%arg0: i32) -> (i32, i32) {
    %c0_i32 = arith.constant 0 : i32
    %c0_i32_0 = arith.constant 0 : i32
    return %arg0, %c0_i32 : i32, i32
  }
  func.func @transform_1(%arg0: i32) -> (i32, i32) {
    %c0_i32 = arith.constant 0 : i32
    %c0_i32_0 = arith.constant 0 : i32
    %c0_i32_1 = arith.constant 0 : i32
    return %c0_i32, %c0_i32_0 : i32, i32
  }
  func.func @transform_2(%arg0: i32) -> (i32, i32, i32) {
    %c0_i32 = arith.constant 0 : i32
    %c0_i32_0 = arith.constant 0 : i32
    %c0_i32_1 = arith.constant 0 : i32
    %c0_i32_2 = arith.constant 0 : i32
    return %c0_i32, %c0_i32_0, %c0_i32_1 : i32, i32, i32
  }
  func.func @transform_3(%arg0: i32) -> (i32, i32) {
    %c0_i32 = arith.constant 0 : i32
    %c0_i32_0 = arith.constant 0 : i32
    %c0_i32_1 = arith.constant 0 : i32
    return %c0_i32, %c0_i32_0 : i32, i32
  }
  func.func @transform_4(%arg0: i32) -> (i32, i32, i32) {
    %c0_i32 = arith.constant 0 : i32
    %c0_i32_0 = arith.constant 0 : i32
    %c0_i32_1 = arith.constant 0 : i32
    %c0_i32_2 = arith.constant 0 : i32
    return %c0_i32, %c0_i32_0, %c0_i32_1 : i32, i32, i32
  }
  func.func @transform_5(%arg0: i32) -> (i32, i32) {
    %c0_i32 = arith.constant 0 : i32
    %c0_i32_0 = arith.constant 0 : i32
    return %arg0, %c0_i32 : i32, i32
  }
}

</mosaic_0001>

<bundles_post_ra>
// kernel: tpu_custom_call.1
= control target key start
LH: loop header
LB: loop body
LE: loop exit
PB: predicated region body
PF: predicated region fallthrough
CT: control target
= control target key end

     0   :  { %10 = vsyncpa [#allocation3], 0  ;;  %s1244_s0 = inlined_call_operand.hbm [shape: f32[8,40], index: 0, kind: input, shape index: {}]   ;;  %s1245_s1 = inlined_call_operand.hbm [shape: f32[40,128], index: 1, kind: input, shape index: {}]   ;;  %s1246_s2 = inlined_call_operand.hbm [shape: f32[7,16,128], index: 2, kind: input, shape index: {}]   ;;  %s1247_s3 = inlined_call_operand.hbm [shape: f32[16,128], index: 3, kind: input, shape index: {}]   ;;  %s1248_s4 = inlined_call_operand.hbm [shape: f32[9,1,128], index: 4, kind: input, shape index: {}]   ;;  %s1249_s5 = inlined_call_operand.hbm [shape: f32[8,128], index: 5, kind: output, shape index: {}]  }
   0x1   :  { %11 = vsyncpa [#allocation6], 0 }
   0x2   :  { %12 = vsyncpa [#allocation9], 0 }
   0x3   :  { %13 = vsyncpa [#allocation4], 0  ;;  %s1128_s18 = smov [#allocation5]  }
   0x4   :  { %s29_s19 = sshll.u32 %s1128_s18, 4  ;;  %s30_s19 = int_to_ptr.vmem [resolvable:$true] %s29_s19 }
   0x5   :  { %s1008_s20 = scalar_lea.vmem %s30_s19, 640  ;;  %p1013_p1 = scmp.lt.s32.totalorder %s30_s19, %s30_s19 }
   0x6   :  { %p1009_p0 = scmp.ne.s32.totalorder %s30_s19, %s1008_s20  ;;  %p1014_p2 = scmp.lt.s32.totalorder %s1008_s20, %s1008_s20 }
   0x8   :  { %p1015_p3 = por %p1014_p2, %p1013_p1 }
   0xa   :  { %p1016_p4 = pnand %p1015_p3, %p1009_p0 }
   0xc   :  { %1019 = shalt.err (!%p1016_p4)
}
   0xd   :  { %s1129_s21 = smov 128   ;;  %s1130_s22 = smov 8  }
   0xe   :  { %35 = dma.hbm_to_vmem [thread:$0]  %s1245_s1, 640, %s30_s19, [#allocation6], %s1129_s21, %s1129_s21, %s1130_s22  }
   0xf   :  { %s1131_s25 = smov [#allocation8]   ;;  %s1132_s27 = smov [#allocation2]  }
  0x10   :  { %s53_s26 = sshll.u32 %s1131_s25, 4  ;;  %s20_s28 = sshll.u32 %s1132_s27, 4  ;;  %s54_s26 = int_to_ptr.vmem [resolvable:$true] %s53_s26  ;;  %s21_s28 = int_to_ptr.vmem [resolvable:$true] %s20_s28 }
  0x11   :  { %s1028_s29 = scalar_lea.vmem %s54_s26, 256  ;;  %p1033_p6 = scmp.lt.s32.totalorder %s54_s26, %s54_s26 }
  0x12   :  { %p1029_p5 = scmp.ne.s32.totalorder %s54_s26, %s1028_s29  ;;  %p1034_p7 = scmp.lt.s32.totalorder %s1028_s29, %s1028_s29 }
  0x14   :  { %p1035_p8 = por %p1034_p7, %p1033_p6 }
  0x16   :  { %p1036_p9 = pnand %p1035_p8, %p1029_p5 }
  0x18   :  { %1039 = shalt.err (!%p1036_p9)
}
  0x19   :  { %59 = dma.hbm_to_vmem [thread:$0]  %s1247_s3, 256, %s54_s26, [#allocation9], %s1129_s21, %s1129_s21, %s1130_s22  }
  0x1a   :  { %s1048_s1 = scalar_lea.vmem %s21_s28, 128  ;;  %p1053_p11 = scmp.lt.s32.totalorder %s21_s28, %s21_s28 }
  0x1b   :  { %p1049_p10 = scmp.ne.s32.totalorder %s21_s28, %s1048_s1  ;;  %p1054_p12 = scmp.lt.s32.totalorder %s1048_s1, %s1048_s1 }
  0x1d   :  { %p1055_p13 = por %p1054_p12, %p1053_p11 }
  0x1f   :  { %p1056_p0 = pnand %p1055_p13, %p1049_p10 }
  0x21   :  { %1059 = shalt.err (!%p1056_p0)
}
  0x22   :  { %23 = dma.hbm_to_vmem [thread:$0]  %s1244_s0, 128, %s21_s28, [#allocation3]  }
  0x23   :  { %s1133_s9 = smov [#allocation7]   ;;  %s1134_s11 = smov [#allocation10]  }
  0x24   :  { %s41_s10 = sshll.u32 %s1133_s9, 4  ;;  %s65_s12 = sshll.u32 %s1134_s11, 4  ;;  %s42_s10 = int_to_ptr.vmem [resolvable:$true] %s41_s10  ;;  %s66_s12 = int_to_ptr.vmem [resolvable:$true] %s65_s12 }
  0x25   :  { %s1068_s13 = scalar_lea.vmem %s42_s10, 1792  ;;  %p1073_p2 = scmp.lt.s32.totalorder %s42_s10, %s42_s10 }
  0x26   :  { %p1069_p1 = scmp.ne.s32.totalorder %s42_s10, %s1068_s13  ;;  %p1074_p3 = scmp.lt.s32.totalorder %s1068_s13, %s1068_s13 }
  0x28   :  { %p1075_p4 = por %p1074_p3, %p1073_p2 }
  0x2a   :  { %p1076_p5 = pnand %p1075_p4, %p1069_p1 }
  0x2c   :  { %1079 = shalt.err (!%p1076_p5)
}
  0x2d   :  { %47 = dma.hbm_to_vmem [thread:$0]  %s1246_s2, 1792, %s42_s10, [#allocation6], %s1129_s21, %s1129_s21, %s1130_s22  }
  0x2e   :  { %s1088_s0 = scalar_lea.vmem %s66_s12, 144  ;;  %s1092_s15 = scalar_lea.vmem %s66_s12, 160 }
  0x2f   :  { %p1089_p6 = scmp.ne.s32.totalorder %s66_s12, %s1088_s0  ;;  %p1093_p7 = scmp.lt.s32.totalorder %s66_s12, %s66_s12 }
  0x30   :  { %p1094_p8 = scmp.lt.s32.totalorder %s1092_s15, %s1088_s0 }
  0x32   :  { %p1095_p9 = por %p1094_p8, %p1093_p7 }
  0x34   :  { %p1096_p10 = pnand %p1095_p9, %p1089_p6 }
  0x36   :  { %1099 = shalt.err (!%p1096_p10)
}
  0x37   :  { %s1135_s16 = smov 16   ;;  %s1136_s17 = smov 1  }
  0x38   :  { %71 = dma.hbm_to_vmem [thread:$0]  %s1248_s4, 144, %s66_s12, [#allocation9], %s1135_s16, %s1135_s16, %s1136_s17  }
  0x39   :  { %1120 = dma.done.wait [#allocation3], 128  }
  0x3a   :  { %1121 = vsyncadd [#allocation3], 4294967168 }
  0x3b   :  { %1122 = dma.done.wait [#allocation6], 2432  }
  0x3c   :  { %1123 = vsyncadd [#allocation6], 4294964864 }
  0x3d   :  { %1124 = dma.done.wait [#allocation9], 400  }
  0x3e   :  { %1125 = vsyncadd [#allocation9], 4294966896  ;;  %v1137_v0 = vmov 0.0   ;;  %vm1138_vm0 = vmmov 0   ;;  %v92_v1 = vld [vmem:[#allocation5 + $0x20] sm:$0xff]  ;;  %v91_v2 = vld [vmem:[#allocation5 + $0x18] sm:$0xff] }
  0x3f   :  { %919 = vmatprep.subr.mxu0 %v1137_v0  ;;  %929 = vmatprep.mubr.msk.f32.mxu0 %vm1138_vm0, %v1137_v0  ;;  %v90_v3 = vld [vmem:[#allocation5 + $0x10] sm:$0xff]  ;;  %v89_v4 = vld [vmem:[#allocation5 + $0x8] sm:$0xff]  ;;  %v88_v5 = vld [vmem:[#allocation5] sm:$0xff]  ;;  %vm100_vm1 = vcmask 326656   ;;  %vm185_vm2 = vcmask 130048   ;;  %s1139_s2 = smov [#allocation11]  }
  0x40   :  { %932 = vmatprep.subr.mxu1 %v1137_v0  ;;  %936 = vmatprep.mubr.msk.f32.mxu1 %vm1138_vm0, %v1137_v0  ;;  %v87_v6 = vld [vmem:[#allocation2] sm:$0xff]  ;;  %v176_v7 = vld [vmem:[#allocation7 + $0x8] sm:$0xff]  ;;  %v175_v8 = vld [vmem:[#allocation7] sm:$0xff]  ;;  %s860_s4 = sshll.u32 %s1139_s2, 4  ;;  %s861_s4 = int_to_ptr.vmem [resolvable:$true] %s860_s4 }
  0x41   :  { %920 = vmatpush3.msra.mxu0 %v92_v1  ;;  %933 = vmatpush3.msra.mxu1 %v176_v7  ;;  %v871_v9 = vld [vmem:[#allocation10] ss:$0 sm:$0xff]  ;;  %v262_v14 = vld [vmem:[#allocation7 + $0x18] sm:$0xff]  ;;  %v261_v15 = vld [vmem:[#allocation7 + $0x10] sm:$0xff]  ;;  %s1100_s20 = scalar_lea.vmem %s861_s4, 128  ;;  %p1105_p12 = scmp.lt.s32.totalorder %s861_s4, %s861_s4 }
  0x42   :  { %921 = vmatprep.subr.mxu0 %v1137_v0  ;;  %934 = vmatprep.subr.mxu1 %v1137_v0  ;;  %v873_v16 = vld [vmem:[#allocation10 + $0x1] ss:$0 sm:$0xff]  ;;  %v347_v21 = vld [vmem:[#allocation7 + $0x28] sm:$0xff]  ;;  %v875_v23 = vld [vmem:[#allocation10 + $0x2] ss:$0 sm:$0xff]  ;;  %p1101_p11 = scmp.ne.s32.totalorder %s861_s4, %s1100_s20  ;;  %p1106_p13 = scmp.lt.s32.totalorder %s1100_s20, %s1100_s20 }
  0x43   :  { %922 = vmatpush3.msra.mxu0 %v91_v2  ;;  %935 = vmatpush3.msra.mxu1 %v175_v8  ;;  %v346_v22 = vld [vmem:[#allocation7 + $0x20] sm:$0xff]  ;;  %v432_v28 = vld [vmem:[#allocation7 + $0x38] sm:$0xff]  ;;  %v431_v29 = vld [vmem:[#allocation7 + $0x30] sm:$0xff] }
  0x44   :  { %923 = vmatprep.subr.mxu0 %v1137_v0  ;;  %939 = vmatprep.subr.mxu1 %v1137_v0  ;;  %v877_v30 = vld [vmem:[#allocation10 + $0x3] ss:$0 sm:$0xff]  ;;  %v517_v35 = vld [vmem:[#allocation7 + $0x48] sm:$0xff]  ;;  %v879_v37 = vld [vmem:[#allocation10 + $0x4] ss:$0 sm:$0xff]  ;;  %p1107_p0 = por %p1106_p13, %p1105_p12 }
  0x45   :  { %924 = vmatpush3.msra.mxu0 %v90_v3  ;;  %v516_v36 = vld [vmem:[#allocation7 + $0x40] sm:$0xff]  ;;  %v602_v42 = vld [vmem:[#allocation7 + $0x58] sm:$0xff]  ;;  %v601_v43 = vld [vmem:[#allocation7 + $0x50] sm:$0xff] }
  0x46   :  { %925 = vmatprep.subr.mxu0 %v1137_v0  ;;  %v881_v44 = vld [vmem:[#allocation10 + $0x5] ss:$0 sm:$0xff]  ;;  %v687_v49 = vld [vmem:[#allocation7 + $0x68] sm:$0xff]  ;;  %v883_v51 = vld [vmem:[#allocation10 + $0x6] ss:$0 sm:$0xff]  ;;  %p1108_p1 = pnand %p1107_p0, %p1101_p11 }
  0x47   :  { %926 = vmatpush3.msra.mxu0 %v89_v4  ;;  %v686_v50 = vld [vmem:[#allocation7 + $0x60] sm:$0xff]  ;;  %v771_v56 = vld [vmem:[#allocation8 + $0x8] sm:$0xff]  ;;  %v770_v57 = vld [vmem:[#allocation8] sm:$0xff] }
  0x48   :  { %927 = vmatprep.subr.mxu0 %v1137_v0  ;;  %v885_v58 = vld [vmem:[#allocation10 + $0x7] ss:$0 sm:$0xff]  ;;  %v887_v63 = vld [vmem:[#allocation10 + $0x8] ss:$0 sm:$0xff] }
  0x49   :  { %928 = vmatpush3.msra.mxu0 %v88_v5 }
  0x4a   :  { %930 = vmatmul.mubr.msk.f32.vlgmr.msra.gmra.mxu0 %vm100_vm1, %v87_v6  ;;  %953 = vmatprep.subr.mxu0 %v1137_v0 }
  0x4b   :  { %957 = vmatprep.mubr.msk.f32.mxu0 %vm1138_vm0, %v1137_v0  ;;  %954 = vmatpush3.msra.mxu0 %v432_v28 }
  0x4c   :  { %955 = vmatprep.subr.mxu0 %v1137_v0 }
  0x4d   :  { %956 = vmatpush3.msra.mxu0 %v431_v29 }
  0x4e   :  { %967 = vmatprep.subr.mxu0 %v1137_v0 }
 0x10a   :  { %v170_v10 = vpop.f32.mrf.mxu0 }
 0x10b   :  { %v171_v11 = vadd.f32 %v871_v9, %v170_v10 }
 0x10c   :  { %v931_v12 = vpop.f32.mrf.mxu0 }
 0x10d   :  { %v174_v13 = vmax.f32 %v171_v11, 0.0 }
 0x10f   :  { %937 = vmatmul.mubr.msk.f32.vlgmr.msra.gmra.mxu1 %vm185_vm2, %v174_v13 }
 0x110   :  { %943 = vmatprep.mubr.msk.f32.mxu1 %vm1138_vm0, %v1137_v0  ;;  %940 = vmatpush3.msra.mxu1 %v262_v14 }
 0x111   :  { %941 = vmatprep.subr.mxu1 %v1137_v0 }
 0x112   :  { %942 = vmatpush3.msra.mxu1 %v261_v15 }
 0x113   :  { %946 = vmatprep.subr.mxu1 %v1137_v0 }
 0x1cf   :  { %v255_v17 = vpop.f32.mrf.mxu1 }
 0x1d0   :  { %v256_v18 = vadd.f32 %v873_v16, %v255_v17 }
 0x1d1   :  { %v938_v19 = vpop.f32.mrf.mxu1 }
 0x1d2   :  { %v259_v20 = vmax.f32 %v256_v18, 0.0 }
 0x1d4   :  { %944 = vmatmul.mubr.msk.f32.vlgmr.msra.gmra.mxu1 %vm185_vm2, %v259_v20 }
 0x1d5   :  { %950 = vmatprep.mubr.msk.f32.mxu1 %vm1138_vm0, %v1137_v0  ;;  %947 = vmatpush3.msra.mxu1 %v347_v21 }
 0x1d6   :  { %948 = vmatprep.subr.mxu1 %v1137_v0 }
 0x1d7   :  { %949 = vmatpush3.msra.mxu1 %v346_v22 }
 0x1d8   :  { %960 = vmatprep.subr.mxu1 %v1137_v0 }
 0x294   :  { %v340_v24 = vpop.f32.mrf.mxu1 }
 0x295   :  { %v341_v25 = vadd.f32 %v875_v23, %v340_v24 }
 0x296   :  { %v945_v26 = vpop.f32.mrf.mxu1 }
 0x297   :  { %v344_v27 = vmax.f32 %v341_v25, 0.0 }
 0x299   :  { %951 = vmatmul.mubr.msk.f32.vlgmr.msra.gmra.mxu1 %vm185_vm2, %v344_v27 }
 0x29a   :  { %964 = vmatprep.mubr.msk.f32.mxu1 %vm1138_vm0, %v1137_v0  ;;  %961 = vmatpush3.msra.mxu1 %v517_v35 }
 0x29b   :  { %962 = vmatprep.subr.mxu1 %v1137_v0 }
 0x29c   :  { %963 = vmatpush3.msra.mxu1 %v516_v36 }
 0x29d   :  { %974 = vmatprep.subr.mxu1 %v1137_v0 }
 0x359   :  { %v425_v31 = vpop.f32.mrf.mxu1 }
 0x35a   :  { %v426_v32 = vadd.f32 %v877_v30, %v425_v31 }
 0x35b   :  { %v952_v33 = vpop.f32.mrf.mxu1 }
 0x35c   :  { %v429_v34 = vmax.f32 %v426_v32, 0.0 }
 0x35e   :  { %958 = vmatmul.mubr.msk.f32.vlgmr.msra.gmra.mxu0 %vm185_vm2, %v429_v34 }
 0x35f   :  { %971 = vmatprep.mubr.msk.f32.mxu0 %vm1138_vm0, %v1137_v0  ;;  %968 = vmatpush3.msra.mxu0 %v602_v42 }
 0x360   :  { %969 = vmatprep.subr.mxu0 %v1137_v0 }
 0x361   :  { %970 = vmatpush3.msra.mxu0 %v601_v43 }
 0x362   :  { %981 = vmatprep.subr.mxu0 %v1137_v0 }
 0x41e   :  { %v510_v38 = vpop.f32.mrf.mxu0 }
 0x41f   :  { %v511_v39 = vadd.f32 %v879_v37, %v510_v38 }
 0x420   :  { %v959_v40 = vpop.f32.mrf.mxu0 }
 0x421   :  { %v514_v41 = vmax.f32 %v511_v39, 0.0 }
 0x423   :  { %965 = vmatmul.mubr.msk.f32.vlgmr.msra.gmra.mxu1 %vm185_vm2, %v514_v41 }
 0x424   :  { %978 = vmatprep.mubr.msk.f32.mxu1 %vm1138_vm0, %v1137_v0  ;;  %975 = vmatpush3.msra.mxu1 %v687_v49 }
 0x425   :  { %976 = vmatprep.subr.mxu1 %v1137_v0 }
 0x426   :  { %977 = vmatpush3.msra.mxu1 %v686_v50 }
 0x4e3   :  { %v595_v45 = vpop.f32.mrf.mxu1 }
 0x4e4   :  { %v596_v46 = vadd.f32 %v881_v44, %v595_v45 }
 0x4e5   :  { %v966_v47 = vpop.f32.mrf.mxu1 }
 0x4e6   :  { %v599_v48 = vmax.f32 %v596_v46, 0.0 }
 0x4e8   :  { %972 = vmatmul.mubr.msk.f32.vlgmr.msra.gmra.mxu0 %vm185_vm2, %v599_v48 }
 0x4e9   :  { %985 = vmatprep.mubr.msk.f32.mxu0 %vm1138_vm0, %v1137_v0  ;;  %982 = vmatpush3.msra.mxu0 %v771_v56 }
 0x4ea   :  { %983 = vmatprep.subr.mxu0 %v1137_v0 }
 0x4eb   :  { %984 = vmatpush3.msra.mxu0 %v770_v57 }
 0x5a8   :  { %v680_v52 = vpop.f32.mrf.mxu0 }
 0x5a9   :  { %v681_v53 = vadd.f32 %v883_v51, %v680_v52 }
 0x5aa   :  { %v973_v54 = vpop.f32.mrf.mxu0 }
 0x5ab   :  { %v684_v55 = vmax.f32 %v681_v53, 0.0 }
 0x5ad   :  { %979 = vmatmul.mubr.msk.f32.vlgmr.msra.gmra.mxu1 %vm185_vm2, %v684_v55 }
 0x66d   :  { %v765_v59 = vpop.f32.mrf.mxu1 }
 0x66e   :  { %v766_v60 = vadd.f32 %v885_v58, %v765_v59 }
 0x66f   :  { %v980_v61 = vpop.f32.mrf.mxu1 }
 0x670   :  { %v769_v62 = vmax.f32 %v766_v60, 0.0 }
 0x672   :  { %986 = vmatmul.mubr.msk.f32.vlgmr.msra.gmra.mxu0 %vm185_vm2, %v769_v62 }
 0x732   :  { %v849_v1 = vpop.f32.mrf.mxu0 }
 0x733   :  { %v850_v2 = vadd.f32 %v887_v63, %v849_v1 }
 0x734   :  { %v987_v3 = vpop.f32.mrf.mxu0 }
 0x735   :  { %853 = vst [vmem:[#allocation11] sm:$0xff] %v850_v2 }
 0x736   :  { %1111 = shalt.err (!%p1108_p1)
}
 0x737   :  { %863 = dma.vmem_to_hbm [thread:$0]  %s861_s4, 128, %s1249_s5, [#allocation4]  }
 0x738   :  { %1126 = dma.done.wait [#allocation4], 128  }
 0x739   :  { %1127 = vsyncadd [#allocation4], 4294967168 }
 0x73a   :  { %867 = vsyncpa [#allocation3], 1 }
 0x73b   :  { %868 = vsyncpa [#allocation6], 1 }
 0x73c   :  { %869 = vsyncpa [#allocation9], 1 }
 0x73d   :  { %870 = vsyncpa [#allocation4], 1 }

</bundles_post_ra>
